<compile_context>
chip_gen: v6e
topology: v6e:2x2x1
jax: 0.10.0
libtpu: 0.0.40
codegen_flags: <defaults>
</compile_context>

<pallas_src>
import jax
import jax.numpy as jnp
from jax.experimental import pallas as pl
from jax.experimental.pallas import tpu as pltpu


# ----------------------------------------------------------------------------
# Pallas kernel: elementwise ReLU on a lane-dense 2D tile.
# ----------------------------------------------------------------------------
def _relu_kernel(x_ref, o_ref):
    o_ref[...] = jnp.maximum(x_ref[...], jnp.zeros((), dtype=o_ref.dtype))


_TARGET_BLOCK_BYTES = 4 * 1024 * 1024  # ~4 MiB per buffer (in + out, double buffered)


def _round_up(a, b):
    return (a + b - 1) // b * b


def _sublane_multiple(dtype):
    # f32 -> 8 sublanes, bf16/f16 -> 16, int8/fp8 -> 32 (packed sublanes).
    return {4: 8, 2: 16, 1: 32}.get(jnp.dtype(dtype).itemsize, 8)


def _relu_2d(x2):
    """ReLU on a (rows, cols) array with cols a multiple of 128 (lane-dense)."""
    rows, cols = x2.shape
    dtype = x2.dtype
    itemsize = jnp.dtype(dtype).itemsize
    mult = _sublane_multiple(dtype)
    n = rows * cols

    # Byte-based block sizing, aligned to the dtype's sublane multiple.
    target_rows = max(mult, (_TARGET_BLOCK_BYTES // (cols * itemsize)) // mult * mult)

    if rows <= mult:
        # Single block; full-array dims satisfy the (8,128)-or-full-dim rule.
        block_rows = rows
    elif rows <= 2 * target_rows:
        # Fits in <=2 blocks: split in two so both v7x TensorCores get work
        # (neutral on single-TC chips).  Last block may be ragged -> masked.
        block_rows = min(_round_up((rows + 1) // 2, mult), target_rows)
    else:
        block_rows = target_rows

    grid = pl.cdiv(rows, block_rows)

    return pl.pallas_call(
        _relu_kernel,
        out_shape=jax.ShapeDtypeStruct((rows, cols), dtype),
        grid=(grid,),
        in_specs=[pl.BlockSpec((block_rows, cols), lambda i: (i, 0))],
        out_specs=pl.BlockSpec((block_rows, cols), lambda i: (i, 0)),
        compiler_params=pltpu.CompilerParams(
            dimension_semantics=("parallel",),
            vmem_limit_bytes=32 * 1024 * 1024,
        ),
        cost_estimate=pl.CostEstimate(
            flops=n, transcendentals=0, bytes_accessed=2 * n * itemsize
        ),
    )(x2)


def relu_pallas(x):
    """ReLU over an arbitrarily-shaped array via a lane-dense tiled Pallas kernel."""
    orig_shape = x.shape
    flat = x.reshape(-1)
    n = flat.shape[0]
    if n == 0:
        return x

    # Pick the widest lane-dense column count that divides n exactly -> no pad, no slice.
    cols = None
    for c in (1024, 512, 256, 128):
        if n % c == 0:
            cols = c
            break

    if cols is not None:
        out2 = _relu_2d(flat.reshape(n // cols, cols))
        return out2.reshape(orig_shape)

    # Rare ragged fallback (n not a multiple of 128): pad by < 128 elements.
    # TODO(synk): this path costs an extra pad+slice pass over HBM; only hit for
    # element counts not divisible by 128.
    cols = 128
    rows = pl.cdiv(n, cols)
    pad = rows * cols - n
    flat = jnp.pad(flat, (0, pad))          # relu(0) == 0 -> padding is inert
    out2 = _relu_2d(flat.reshape(rows, cols))
    return out2.reshape(-1)[:n].reshape(orig_shape)


# ----------------------------------------------------------------------------
# Module-equivalent forward: qrelu(qat=False).forward(input) == relu(input)
# ----------------------------------------------------------------------------
def qrelu_forward(x):
    return relu_pallas(x)


if __name__ == "__main__":
    key = jax.random.PRNGKey(0)
    x = jax.random.normal(key, (2, 4, 16, 16), jnp.float32)  # NCHW-like small input

    fwd = jax.jit(qrelu_forward)
    y = fwd(x)
    jax.block_until_ready(y)

    # correctness check against the pure-JAX reference
    y_ref = jnp.maximum(x, 0.0)
    assert y.shape == x.shape, y.shape
    assert bool(jnp.all(jnp.isfinite(y)))
    assert bool(jnp.allclose(y, y_ref)), "mismatch vs. reference ReLU"
    print("KERNEL_OK")
</pallas_src>

<mosaic_0001>
module attributes {stable_mosaic.version = 11 : i64} {
  func.func @_relu_kernel(%arg0: i32, %arg1: memref<2x1024xf32, #tpu.memory_space<vmem>>, %arg2: memref<2x1024xf32, #tpu.memory_space<vmem>>) attributes {dimension_semantics = [#tpu.dimension_semantics<parallel>], iteration_bounds = array<i64: 1>, scalar_prefetch = 0 : i64, scratch_operands = 0 : i64, tpu.core_type = #tpu.core_type<tc>, window_params = [{transform_indices = @transform_0, window_bounds = array<i64: 2, 1024>}, {transform_indices = @transform_1, window_bounds = array<i64: 2, 1024>}]} {
    %c0 = arith.constant 0 : index
    %c0_0 = arith.constant 0 : index
    %0 = vector.load %arg1[%c0, %c0_0] : memref<2x1024xf32, #tpu.memory_space<vmem>>, vector<2x1024xf32>
    %cst = arith.constant 0.000000e+00 : f32
    %1 = vector.broadcast %cst : f32 to vector<2x1024xf32>
    %2 = arith.maximumf %0, %1 : vector<2x1024xf32>
    %c0_1 = arith.constant 0 : index
    %c0_2 = arith.constant 0 : index
    %3 = vector.load %arg2[%c0_1, %c0_2] : memref<2x1024xf32, #tpu.memory_space<vmem>>, vector<2x1024xf32>
    tpu.vector_store %arg2[%c0_1, %c0_2], %2 {strides = array<i32>} : memref<2x1024xf32, #tpu.memory_space<vmem>>, vector<2x1024xf32>,
    return
  }
  func.func @transform_0(%arg0: i32) -> (i32, i32) {
    %c0_i32 = arith.constant 0 : i32
    %c0_i32_0 = arith.constant 0 : i32
    return %arg0, %c0_i32 : i32, i32
  }
  func.func @transform_1(%arg0: i32) -> (i32, i32) {
    %c0_i32 = arith.constant 0 : i32
    %c0_i32_0 = arith.constant 0 : i32
    return %arg0, %c0_i32 : i32, i32
  }
}

</mosaic_0001>

<bundles_post_ra>
// kernel: qrelu_forward.1
= control target key start
LH: loop header
LB: loop body
LE: loop exit
PB: predicated region body
PF: predicated region fallthrough
CT: control target
= control target key end

     0   :  { %s40_s0 = inlined_call_operand.vmem [shape: f32[2,1024], index: 0, kind: input, shape index: {}]   ;;  %s41_s1 = inlined_call_operand.vmem [shape: f32[2,1024], index: 1, kind: output, shape index: {}]  }
   0x1   :  { %v8_v0 = vld [vmem:[%s40_s0] sm:$0xff]  ;;  %v9_v1 = vld [vmem:[%s40_s0 + $0x8] sm:$0xff] }
   0x2   :  { %v10_v2 = vmax.f32 %v8_v0, 0.0  ;;  %v11_v3 = vmax.f32 %v9_v1, 0.0 }
   0x4   :  { %12 = vst [vmem:[%s41_s1] sm:$0xff] %v10_v2  ;;  %13 = vst [vmem:[%s41_s1 + $0x8] sm:$0xff] %v11_v3 }

</bundles_post_ra>
